<compile_context>
chip_gen: v6e
topology: v6e:2x2x1
jax: 0.10.0
libtpu: 0.0.40
codegen_flags: <defaults>
</compile_context>

<pallas_src>
import jax
import jax.numpy as jnp
from jax.experimental import pallas as pl
from jax.experimental.pallas import tpu as pltpu

_LANES = 1024        # lane-dense last dim (multiple of 128)
_ROW_TILE_MAX = 512  # (512, 1024) f32 block = 2 MiB


def _biased_elu_kernel(x_ref, o_ref):
    x = x_ref[...]
    if x.dtype == jnp.float32:
        # Native f32 path — no casts needed.
        y = jnp.where(x > 0.0, x + 1.0, jnp.exp(x))
    else:
        # Upcast sub-32-bit inputs; required on v5e (no bf16 VPU/EUP path) and
        # harmless elsewhere for this mem-bound kernel.
        xf = x.astype(jnp.float32)
        y = jnp.where(xf > 0.0, xf + 1.0, jnp.exp(xf))
    o_ref[...] = y.astype(o_ref.dtype)


def biased_elu(x):
    """ELU(x) + 1, elementwise, computed in a Pallas TPU kernel."""
    orig_shape = x.shape
    orig_dtype = x.dtype
    total = x.size
    if total == 0:
        return x

    # Lane-dense slab: flatten fully, view as (rows, 1024).
    rows = pl.cdiv(total, _LANES)
    row_tile = rows if rows <= _ROW_TILE_MAX else _ROW_TILE_MAX
    rows_padded = pl.cdiv(rows, row_tile) * row_tile
    padded_total = rows_padded * _LANES

    flat = x.reshape(-1)
    if padded_total != total:
        # Zero padding: exp(0) = 1 in the padded region, sliced off afterwards.
        flat = jnp.pad(flat, (0, padded_total - total))
    x2d = flat.reshape(rows_padded, _LANES)

    grid = (rows_padded // row_tile,)

    out2d = pl.pallas_call(
        _biased_elu_kernel,
        out_shape=jax.ShapeDtypeStruct((rows_padded, _LANES), orig_dtype),
        grid=grid,
        in_specs=[pl.BlockSpec((row_tile, _LANES), lambda i: (i, 0))],
        out_specs=pl.BlockSpec((row_tile, _LANES), lambda i: (i, 0)),
        compiler_params=pltpu.CompilerParams(
            dimension_semantics=("parallel",),
        ),
    )(x2d)

    out_flat = out2d.reshape(-1)
    if padded_total != total:
        out_flat = out_flat[:total]
    return out_flat.reshape(orig_shape)


def _reference(x):
    # Pure-JAX reference matching torch.nn.ELU()(x) + 1
    return jnp.where(x > 0, x, jnp.expm1(x)) + 1.0


if __name__ == "__main__":
    key = jax.random.PRNGKey(0)
    # Small shape consistent with a typical NCHW activation tensor.
    x = jax.random.normal(key, (2, 4, 16, 16), dtype=jnp.float32)

    out = biased_elu(x)
    out = jax.block_until_ready(out)

    ref = _reference(x)
    assert out.shape == x.shape and out.dtype == x.dtype
    assert jnp.allclose(out, ref, atol=1e-5, rtol=1e-5)

    # Also exercise the multi-block (padded, tiled) path on a larger tensor.
    x_big = jax.random.normal(jax.random.PRNGKey(1), (4, 32, 56, 56), dtype=jnp.float32)
    out_big = jax.block_until_ready(biased_elu(x_big))
    assert jnp.allclose(out_big, _reference(x_big), atol=1e-5, rtol=1e-5)

    print("KERNEL_OK")
</pallas_src>

<mosaic_0001>
module attributes {stable_mosaic.version = 11 : i64} {
  func.func @_biased_elu_kernel(%arg0: i32, %arg1: memref<2x1024xf32, #tpu.memory_space<vmem>>, %arg2: memref<2x1024xf32, #tpu.memory_space<vmem>>) attributes {dimension_semantics = [#tpu.dimension_semantics<parallel>], iteration_bounds = array<i64: 1>, scalar_prefetch = 0 : i64, scratch_operands = 0 : i64, tpu.core_type = #tpu.core_type<tc>, window_params = [{transform_indices = @transform_0, window_bounds = array<i64: 2, 1024>}, {transform_indices = @transform_1, window_bounds = array<i64: 2, 1024>}]} {
    %c0 = arith.constant 0 : index
    %c0_0 = arith.constant 0 : index
    %0 = vector.load %arg1[%c0, %c0_0] : memref<2x1024xf32, #tpu.memory_space<vmem>>, vector<2x1024xf32>
    %cst = arith.constant 0.000000e+00 : f32
    %1 = vector.broadcast %cst : f32 to vector<2x1024xf32>
    %2 = arith.cmpf ogt, %0, %1 : vector<2x1024xf32>
    %cst_1 = arith.constant 1.000000e+00 : f32
    %3 = vector.broadcast %cst_1 : f32 to vector<2x1024xf32>
    %4 = arith.addf %0, %3 : vector<2x1024xf32>
    %5 = math.exp %0 : vector<2x1024xf32>
    %6 = arith.select %2, %4, %5 : vector<2x1024xi1>, vector<2x1024xf32>
    %c0_2 = arith.constant 0 : index
    %c0_3 = arith.constant 0 : index
    %7 = vector.load %arg2[%c0_2, %c0_3] : memref<2x1024xf32, #tpu.memory_space<vmem>>, vector<2x1024xf32>
    tpu.vector_store %arg2[%c0_2, %c0_3], %6 {strides = array<i32>} : memref<2x1024xf32, #tpu.memory_space<vmem>>, vector<2x1024xf32>,
    return
  }
  func.func @transform_0(%arg0: i32) -> (i32, i32) {
    %c0_i32 = arith.constant 0 : i32
    %c0_i32_0 = arith.constant 0 : i32
    return %arg0, %c0_i32 : i32, i32
  }
  func.func @transform_1(%arg0: i32) -> (i32, i32) {
    %c0_i32 = arith.constant 0 : i32
    %c0_i32_0 = arith.constant 0 : i32
    return %arg0, %c0_i32 : i32, i32
  }
}

</mosaic_0001>

<bundles_post_ra>
// kernel: tpu_custom_call.1
= control target key start
LH: loop header
LB: loop body
LE: loop exit
PB: predicated region body
PF: predicated region fallthrough
CT: control target
= control target key end

     0   :  { %6 = vsyncpa [#allocation3], 0  ;;  %s118_s0 = inlined_call_operand.hbm [shape: f32[2,1024], index: 0, kind: input, shape index: {}]   ;;  %s119_s1 = inlined_call_operand.hbm [shape: f32[2,1024], index: 1, kind: output, shape index: {}]  }
   0x1   :  { %7 = vsyncpa [#allocation4], 0  ;;  %s100_s6 = smov [#allocation2]  }
   0x2   :  { %s14_s7 = sshll.u32 %s100_s6, 4  ;;  %s15_s7 = int_to_ptr.vmem [resolvable:$true] %s14_s7 }
   0x3   :  { %s64_s8 = scalar_lea.vmem %s15_s7, 256  ;;  %p69_p1 = scmp.lt.s32.totalorder %s15_s7, %s15_s7 }
   0x4   :  { %p65_p0 = scmp.ne.s32.totalorder %s15_s7, %s64_s8  ;;  %p70_p2 = scmp.lt.s32.totalorder %s64_s8, %s64_s8 }
   0x6   :  { %p71_p3 = por %p70_p2, %p69_p1 }
   0x8   :  { %p72_p4 = pnand %p71_p3, %p65_p0 }
   0xa   :  { %75 = shalt.err (!%p72_p4)
}
   0xb   :  { %17 = dma.hbm_to_vmem [thread:$0]  %s118_s0, 256, %s15_s7, [#allocation3]  }
   0xc   :  { %96 = dma.done.wait [#allocation3], 256  }
   0xd   :  { %97 = vsyncadd [#allocation3], 4294967040  ;;  %v21_v0 = vld [vmem:[#allocation2] sm:$0xff]  ;;  %v22_v1 = vld [vmem:[#allocation2 + $0x8] sm:$0xff]  ;;  %s101_s11 = smov [#allocation5]  }
   0xe   :  { %v27_v2 = vmul.f32 1.442695, %v21_v0  ;;  %v29_v3 = vmul.f32 1.442695, %v22_v1  ;;  %v25_v4 = vadd.f32 1.0, %v21_v0  ;;  %vm23_vm0 = vcmp.gt.f32.partialorder %v21_v0, 0.0 }
   0xf   :  { %v26_v5 = vadd.f32 1.0, %v22_v1  ;;  %s41_s12 = sshll.u32 %s101_s11, 4  ;;  %vm24_vm1 = vcmp.gt.f32.partialorder %v22_v1, 0.0  ;;  %s42_s12 = int_to_ptr.vmem [resolvable:$true] %s41_s12 }
  0x10   :  { %52 = vpow2.f32 %v27_v2  ;;  %s76_s0 = scalar_lea.vmem %s42_s12, 256  ;;  %p81_p6 = scmp.lt.s32.totalorder %s42_s12, %s42_s12 }
  0x11   :  { %54 = vpow2.f32 %v29_v3  ;;  %p77_p5 = scmp.ne.s32.totalorder %s42_s12, %s76_s0  ;;  %p82_p7 = scmp.lt.s32.totalorder %s76_s0, %s76_s0 }
  0x13   :  { %p83_p8 = por %p82_p7, %p81_p6 }
  0x15   :  { %p84_p9 = pnand %p83_p8, %p77_p5 }
  0x1d   :  { %v53_v6 = vpop.eup %52 }
  0x1e   :  { %v55_v7 = vpop.eup %54  ;;  %v31_v8 = vsel %vm23_vm0, %v25_v4, %v53_v6 }
  0x1f   :  { %33 = vst [vmem:[#allocation5] sm:$0xff] %v31_v8  ;;  %v32_v9 = vsel %vm24_vm1, %v26_v5, %v55_v7 }
  0x20   :  { %34 = vst [vmem:[#allocation5 + $0x8] sm:$0xff] %v32_v9 }
  0x21   :  { %87 = shalt.err (!%p84_p9)
}
  0x22   :  { %44 = dma.vmem_to_hbm [thread:$0]  %s42_s12, 256, %s119_s1, [#allocation4]  }
  0x23   :  { %98 = dma.done.wait [#allocation4], 256  }
  0x24   :  { %99 = vsyncadd [#allocation4], 4294967040 }
  0x25   :  { %48 = vsyncpa [#allocation3], 1 }
  0x26   :  { %49 = vsyncpa [#allocation4], 1 }

</bundles_post_ra>
